<compile_context>
chip_gen: v5e
topology: v5e:2x2
jax: 0.10.0
libtpu: 0.0.40
codegen_flags: <defaults>
</compile_context>

<pallas_src>
import functools

import jax
import jax.numpy as jnp
from jax.experimental import pallas as pl
from jax.experimental.pallas import tpu as pltpu

LANES = 128


def eventcls_kernel(x_ref, w_ref, b_ref, y_ref, score_ref, part_ref, *,
                    n_batch, n_class, block_b):
    """One batch tile of the EventCls classification head.

    x_ref:     [block_b, H]  bf16  pooler_output tile
    w_ref:     [H, Cp]       bf16  fc weight (class dim padded to Cp), resident
    b_ref:     [1, Cp]       f32   fc bias (padded)
    y_ref:     [block_b, Cp] f32   labels tile (padded with zeros)
    score_ref: [block_b, Cp] f32   logits tile (lane-dense store)
    part_ref:  [4, Cp]       f32   per-block column partials:
                                   row 0 = bce sum, 1 = right, 2 = pre, 3 = actual
    """
    i = pl.program_id(0)

    x = x_ref[...]
    w = w_ref[...]
    b = b_ref[...]
    y = y_ref[...]

    # fc: score = x @ W + b   (bf16 MXU inputs, f32 accumulation)
    score = jnp.dot(x, w, preferred_element_type=jnp.float32) + b
    score_ref[...] = score.astype(score_ref.dtype)

    cp = score.shape[1]
    # Mask padded batch rows and padded class columns out of every reduction.
    row = jax.lax.broadcasted_iota(jnp.int32, (block_b, cp), 0) + i * block_b
    col = jax.lax.broadcasted_iota(jnp.int32, (block_b, cp), 1)
    valid = jnp.logical_and(row < n_batch, col < n_class).astype(jnp.float32)

    # BCEWithLogitsLoss, numerically stable form (sum here; mean in wrapper):
    #   max(s, 0) - s*y + log1p(exp(-|s|))
    bce = (jnp.maximum(score, 0.0) - score * y
           + jnp.log1p(jnp.exp(-jnp.abs(score)))) * valid

    # Accuracy counters fused on a single comparison result.
    pred = jnp.where(score > 0.0, 1.0, 0.0) * valid     # (score > 0), masked
    yv = y * valid

    part_ref[...] = jnp.concatenate(
        [jnp.sum(bce, axis=0, keepdims=True),            # bce partial sum
         jnp.sum(pred * yv, axis=0, keepdims=True),      # right
         jnp.sum(pred, axis=0, keepdims=True),           # pre_num
         jnp.sum(yv, axis=0, keepdims=True)],            # actual_num
        axis=0)


def eventcls_forward(pooler_output, labels, fc_w, fc_b, acc_result=None, *,
                     block_b=512):
    """Pallas implementation of EventCls.forward (mode != 'test') given the
    encoder pooler_output. Returns {'loss', 'acc_result'} plus raw scores.

    fc_w is stored transposed as [H, C] so score = x @ W + b, semantically
    identical to nn.Linear(hidden_size, class_num).
    """
    B, H = pooler_output.shape
    C = fc_w.shape[1]

    cp = pl.cdiv(C, LANES) * LANES                        # lane-dense class dim
    block_b = max(8, (min(block_b, pl.cdiv(B, 8) * 8) // 8) * 8)
    bp = pl.cdiv(B, block_b) * block_b                    # padded batch
    nb = bp // block_b

    x = jnp.pad(pooler_output.astype(jnp.bfloat16), ((0, bp - B), (0, 0)))
    w = jnp.pad(fc_w.astype(jnp.bfloat16), ((0, 0), (0, cp - C)))
    b = jnp.pad(fc_b.reshape(1, C).astype(jnp.float32), ((0, 0), (0, cp - C)))
    y = jnp.pad(labels.astype(jnp.float32), ((0, bp - B), (0, cp - C)))

    kernel = functools.partial(eventcls_kernel, n_batch=B, n_class=C,
                               block_b=block_b)

    score_p, partials = pl.pallas_call(
        kernel,
        out_shape=(
            jax.ShapeDtypeStruct((bp, cp), jnp.float32),      # logits (padded)
            jax.ShapeDtypeStruct((nb, 4, cp), jnp.float32),   # per-block partials
        ),
        grid=(nb,),
        in_specs=[
            pl.BlockSpec((block_b, H), lambda i: (i, 0)),     # x tile
            pl.BlockSpec((H, cp), lambda i: (0, 0)),          # W resident
            pl.BlockSpec((1, cp), lambda i: (0, 0)),          # b resident
            pl.BlockSpec((block_b, cp), lambda i: (i, 0)),    # labels tile
        ],
        out_specs=(
            pl.BlockSpec((block_b, cp), lambda i: (i, 0)),
            pl.BlockSpec((None, 4, cp), lambda i: (i, 0, 0)),
        ),
        compiler_params=pltpu.CompilerParams(
            dimension_semantics=("parallel",),
            vmem_limit_bytes=32 * 1024 * 1024,
        ),
    )(x, w, b, y)

    score = score_p[:B, :C]
    sums = jnp.sum(partials, axis=(0, 2))                # on-device reduce, [4]
    loss = sums[0] / float(B * C)

    if acc_result is None:
        acc_result = {'right': 0, 'pre_num': 0, 'actual_num': 0}
    # Keep the counters on device (no per-call int() host sync).
    acc_result = {
        'right': acc_result['right'] + sums[1].astype(jnp.int32),
        'pre_num': acc_result['pre_num'] + sums[2].astype(jnp.int32),
        'actual_num': acc_result['actual_num'] + sums[3].astype(jnp.int32),
    }
    return {'loss': loss, 'acc_result': acc_result, 'score': score}


if __name__ == "__main__":
    # Small shapes consistent with the module's head:
    #   batch B=24, hidden H=128 (stand-in for 768), class_num C=10.
    # block_b=8 forces a 3-step batch grid and exercises row/column masking.
    B, H, C = 24, 128, 10
    key = jax.random.PRNGKey(0)
    k_x, k_w, k_b, k_y = jax.random.split(key, 4)

    pooler_output = jax.random.normal(k_x, (B, H), dtype=jnp.float32)
    fc_w = jax.random.normal(k_w, (H, C), dtype=jnp.float32) * 0.05
    fc_b = jax.random.normal(k_b, (C,), dtype=jnp.float32) * 0.05
    labels = jax.random.bernoulli(k_y, 0.3, (B, C)).astype(jnp.int32)

    out = eventcls_forward(pooler_output, labels, fc_w, fc_b,
                           acc_result=None, block_b=8)
    jax.block_until_ready(out['score'])
    jax.block_until_ready(out['loss'])

    # Pure-JAX reference of the head (same bf16 matmul inputs as the kernel).
    xr = pooler_output.astype(jnp.bfloat16).astype(jnp.float32)
    wr = fc_w.astype(jnp.bfloat16).astype(jnp.float32)
    score_ref = xr @ wr + fc_b
    yf = labels.astype(jnp.float32)
    bce_ref = jnp.mean(jnp.maximum(score_ref, 0.0) - score_ref * yf
                       + jnp.log1p(jnp.exp(-jnp.abs(score_ref))))
    assert jnp.allclose(out['score'], score_ref, atol=1e-4, rtol=1e-4)
    assert jnp.allclose(out['loss'], bce_ref, atol=1e-4, rtol=1e-4)
    pred = (score_ref > 0).astype(jnp.int32)
    assert int(out['acc_result']['pre_num']) == int(pred.sum())
    assert int(out['acc_result']['actual_num']) == int((labels == 1).sum())
    assert int(out['acc_result']['right']) == int(
        ((pred == labels).astype(jnp.int32) * labels).sum())

    print("KERNEL_OK")
</pallas_src>

<mosaic_0001>
module attributes {stable_mosaic.version = 11 : i64} {
  func.func @eventcls_kernel(%arg0: i32, %arg1: memref<8x128xbf16, #tpu.memory_space<vmem>>, %arg2: memref<128x128xbf16, #tpu.memory_space<vmem>>, %arg3: memref<1x128xf32, #tpu.memory_space<vmem>>, %arg4: memref<8x128xf32, #tpu.memory_space<vmem>>, %arg5: memref<8x128xf32, #tpu.memory_space<vmem>>, %arg6: memref<1x4x128xf32, #tpu.memory_space<vmem>>) attributes {dimension_semantics = [#tpu.dimension_semantics<parallel>], iteration_bounds = array<i64: 3>, scalar_prefetch = 0 : i64, scratch_operands = 0 : i64, tpu.core_type = #tpu.core_type<tc>, window_params = [{transform_indices = @transform_0, window_bounds = array<i64: 8, 128>}, {pipeline_mode = #tpu.pipeline_mode<synchronous>, transform_indices = @transform_1, window_bounds = array<i64: 128, 128>}, {pipeline_mode = #tpu.pipeline_mode<synchronous>, transform_indices = @transform_2, window_bounds = array<i64: 1, 128>}, {transform_indices = @transform_3, window_bounds = array<i64: 8, 128>}, {transform_indices = @transform_4, window_bounds = array<i64: 8, 128>}, {transform_indices = @transform_5, window_bounds = array<i64: 1, 4, 128>}]} {
    %c0 = arith.constant 0 : index
    %c0_0 = arith.constant 0 : index
    %0 = vector.load %arg1[%c0, %c0_0] : memref<8x128xbf16, #tpu.memory_space<vmem>>, vector<8x128xbf16>
    %c0_1 = arith.constant 0 : index
    %c0_2 = arith.constant 0 : index
    %1 = vector.load %arg2[%c0_1, %c0_2] : memref<128x128xbf16, #tpu.memory_space<vmem>>, vector<128x128xbf16>
    %c0_3 = arith.constant 0 : index
    %c0_4 = arith.constant 0 : index
    %2 = vector.load %arg3[%c0_3, %c0_4] : memref<1x128xf32, #tpu.memory_space<vmem>>, vector<1x128xf32>
    %c0_5 = arith.constant 0 : index
    %c0_6 = arith.constant 0 : index
    %3 = vector.load %arg4[%c0_5, %c0_6] : memref<8x128xf32, #tpu.memory_space<vmem>>, vector<8x128xf32>
    %cst = arith.constant dense<0.000000e+00> : vector<8x128xf32>
    %4 = tpu.matmul %0, %1, %cst {dimension_numbers = #tpu.dot_dimension_numbers<[1], [0], [0], [1], [0, 0, 1, 1], [], []>} : vector<8x128xbf16>, vector<128x128xbf16>, vector<8x128xf32> -> vector<8x128xf32>
    %5 = vector.broadcast %2 : vector<1x128xf32> to vector<8x128xf32>
    %6 = arith.addf %4, %5 : vector<8x128xf32>
    %c0_7 = arith.constant 0 : index
    %c0_8 = arith.constant 0 : index
    %7 = vector.load %arg5[%c0_7, %c0_8] : memref<8x128xf32, #tpu.memory_space<vmem>>, vector<8x128xf32>
    tpu.vector_store %arg5[%c0_7, %c0_8], %6 {strides = array<i32>} : memref<8x128xf32, #tpu.memory_space<vmem>>, vector<8x128xf32>,
    %8 = tpu.iota {dimensions = array<i32: 0>} : vector<8x128xi32>
    %c8_i32 = arith.constant 8 : i32
    %9 = arith.muli %arg0, %c8_i32 : i32
    %10 = vector.broadcast %9 : i32 to vector<8x128xi32>
    %11 = arith.addi %8, %10 : vector<8x128xi32>
    %12 = tpu.iota {dimensions = array<i32: 1>} : vector<8x128xi32>
    %c24_i32 = arith.constant 24 : i32
    %13 = vector.broadcast %c24_i32 : i32 to vector<8x128xi32>
    %14 = arith.cmpi slt, %11, %13 : vector<8x128xi32>
    %c10_i32 = arith.constant 10 : i32
    %15 = vector.broadcast %c10_i32 : i32 to vector<8x128xi32>
    %16 = arith.cmpi slt, %12, %15 : vector<8x128xi32>
    %17 = arith.andi %14, %16 : vector<8x128xi1>
    %18 = arith.extui %17 : vector<8x128xi1> to vector<8x128xi32>
    %19 = arith.sitofp %18 : vector<8x128xi32> to vector<8x128xf32>
    %cst_9 = arith.constant 0.000000e+00 : f32
    %20 = vector.broadcast %cst_9 : f32 to vector<8x128xf32>
    %21 = arith.maximumf %6, %20 : vector<8x128xf32>
    %22 = arith.mulf %6, %3 : vector<8x128xf32>
    %23 = arith.subf %21, %22 : vector<8x128xf32>
    %24 = math.absf %6 : vector<8x128xf32>
    %cst_10 = arith.constant 0.000000e+00 : f32
    %25 = vector.broadcast %cst_10 : f32 to vector<8x128xf32>
    %26 = arith.subf %25, %24 : vector<8x128xf32>
    %27 = math.exp %26 : vector<8x128xf32>
    %28 = math.log1p %27 : vector<8x128xf32>
    %29 = arith.addf %23, %28 : vector<8x128xf32>
    %30 = arith.mulf %29, %19 : vector<8x128xf32>
    %cst_11 = arith.constant 0.000000e+00 : f32
    %31 = vector.broadcast %cst_11 : f32 to vector<8x128xf32>
    %32 = arith.cmpf ogt, %6, %31 : vector<8x128xf32>
    %cst_12 = arith.constant 1.000000e+00 : f32
    %cst_13 = arith.constant 0.000000e+00 : f32
    %33 = vector.broadcast %cst_12 : f32 to vector<8x128xf32>
    %34 = vector.broadcast %cst_13 : f32 to vector<8x128xf32>
    %35 = arith.select %32, %33, %34 : vector<8x128xi1>, vector<8x128xf32>
    %36 = arith.mulf %35, %19 : vector<8x128xf32>
    %37 = arith.mulf %3, %19 : vector<8x128xf32>
    %cst_14 = arith.constant dense<0.000000e+00> : vector<128xf32>
    %38 = vector.multi_reduction <add>, %30, %cst_14 [0] : vector<8x128xf32> to vector<128xf32>
    %39 = vector.shape_cast %38 : vector<128xf32> to vector<1x128xf32>
    %40 = arith.mulf %36, %37 : vector<8x128xf32>
    %cst_15 = arith.constant dense<0.000000e+00> : vector<128xf32>
    %41 = vector.multi_reduction <add>, %40, %cst_15 [0] : vector<8x128xf32> to vector<128xf32>
    %42 = vector.shape_cast %41 : vector<128xf32> to vector<1x128xf32>
    %cst_16 = arith.constant dense<0.000000e+00> : vector<128xf32>
    %43 = vector.multi_reduction <add>, %36, %cst_16 [0] : vector<8x128xf32> to vector<128xf32>
    %44 = vector.shape_cast %43 : vector<128xf32> to vector<1x128xf32>
    %cst_17 = arith.constant dense<0.000000e+00> : vector<128xf32>
    %45 = vector.multi_reduction <add>, %37, %cst_17 [0] : vector<8x128xf32> to vector<128xf32>
    %46 = vector.shape_cast %45 : vector<128xf32> to vector<1x128xf32>
    %47 = tpu.concatenate %39, %42, %44, %46 in 0 : vector<1x128xf32>, vector<1x128xf32>, vector<1x128xf32>, vector<1x128xf32> -> vector<4x128xf32>
    %c0_18 = arith.constant 0 : index
    %c0_19 = arith.constant 0 : index
    %c0_20 = arith.constant 0 : index
    %48 = vector.load %arg6[%c0_18, %c0_19, %c0_20] : memref<1x4x128xf32, #tpu.memory_space<vmem>>, vector<1x4x128xf32>
    %49 = vector.shape_cast %48 : vector<1x4x128xf32> to vector<4x128xf32>
    %50 = vector.shape_cast %47 : vector<4x128xf32> to vector<1x4x128xf32>
    tpu.vector_store %arg6[%c0_18, %c0_19, %c0_20], %50 {strides = array<i32>} : memref<1x4x128xf32, #tpu.memory_space<vmem>>, vector<1x4x128xf32>,
    return
  }
  func.func @transform_0(%arg0: i32) -> (i32, i32) {
    %c0_i32 = arith.constant 0 : i32
    %c0_i32_0 = arith.constant 0 : i32
    return %arg0, %c0_i32 : i32, i32
  }
  func.func @transform_1(%arg0: i32) -> (i32, i32) {
    %c0_i32 = arith.constant 0 : i32
    %c0_i32_0 = arith.constant 0 : i32
    %c0_i32_1 = arith.constant 0 : i32
    return %c0_i32, %c0_i32_0 : i32, i32
  }
  func.func @transform_2(%arg0: i32) -> (i32, i32) {
    %c0_i32 = arith.constant 0 : i32
    %c0_i32_0 = arith.constant 0 : i32
    %c0_i32_1 = arith.constant 0 : i32
    return %c0_i32, %c0_i32_0 : i32, i32
  }
  func.func @transform_3(%arg0: i32) -> (i32, i32) {
    %c0_i32 = arith.constant 0 : i32
    %c0_i32_0 = arith.constant 0 : i32
    return %arg0, %c0_i32 : i32, i32
  }
  func.func @transform_4(%arg0: i32) -> (i32, i32) {
    %c0_i32 = arith.constant 0 : i32
    %c0_i32_0 = arith.constant 0 : i32
    return %arg0, %c0_i32 : i32, i32
  }
  func.func @transform_5(%arg0: i32) -> (i32, i32, i32) {
    %c0_i32 = arith.constant 0 : i32
    %c0_i32_0 = arith.constant 0 : i32
    %c0_i32_1 = arith.constant 0 : i32
    return %arg0, %c0_i32, %c0_i32_0 : i32, i32, i32
  }
}

</mosaic_0001>

<bundles_post_ra>
// kernel: tpu_custom_call.1
= control target key start
LH: loop header
LB: loop body
LE: loop exit
PB: predicated region body
PF: predicated region fallthrough
CT: control target
= control target key end

     0   :  { %s1199_s0 = inlined_call_operand.hbm [shape: bf16[24,128], index: 0, kind: input, shape index: {}]   ;;  %s1200_s1 = inlined_call_operand.hbm [shape: bf16[128,128], index: 1, kind: input, shape index: {}]   ;;  %s1201_s2 = inlined_call_operand.vmem [shape: f32[1,128], index: 2, kind: input, shape index: {}]   ;;  %s1202_s3 = inlined_call_operand.hbm [shape: f32[24,128], index: 3, kind: input, shape index: {}]   ;;  %s1203_s4 = inlined_call_operand.hbm [shape: f32[24,128], index: 4, kind: output, shape index: {0}]   ;;  %s1204_s5 = inlined_call_operand.hbm [shape: f32[3,4,128], index: 5, kind: output, shape index: {1}]  }
   0x1   :  { %1206 = sst [smem:[#allocation18_spill]] %s1199_s0 }
   0x2   :  { %1207 = sst [smem:[#allocation19_spill]] %s1200_s1 }
   0x3   :  { %11 = vsyncpa [#allocation3], 0 }
   0x4   :  { %13 = vsyncpa [#allocation3 + $0x1], 0 }
   0x5   :  { %14 = vsyncpa [#allocation6], 0 }
   0x6   :  { %15 = vsyncpa [#allocation4], 0 }
   0x7   :  { %17 = vsyncpa [#allocation4 + $0x1], 0 }
   0x8   :  { %18 = vsyncpa [#allocation10], 0 }
   0x9   :  { %20 = vsyncpa [#allocation10 + $0x1], 0  ;;  %s993_s18 = smov 0   ;;  %s995_s19 = smov 0  }
   0xa   :  { %s997_s20 = smov 0   ;;  %s999_s21 = smov 0  }
   0xb LB: > { %1208 = sst [smem:[#allocation16_spill]] %s953_s20  ;;  %s1014_s22 = sadd.s32 4294967295, %s957_s21   ;;  %s957_s21 = sphi %s999_s21, %s1223_s21   ;;  %s953_s20 = sphi %s997_s20, %s1220_s20   ;;  %s949_s19 = sphi %s995_s19, %s1222_s19   ;;  %s945_s18 = sphi %s993_s18, %s1221_s18  }
   0xc   : > { %s624_s23 = sadd.s32 4294967294, %s957_s21   ;;  %s1018_s24 = sadd.s32 1, %s957_s21  }
   0xd   : > { %s33_s25 = sadd.s32 1, %s953_s20  ;;  %s30_s26 = ssub.s32 %s957_s21, %s1018_s24 }
   0xe   : > { %p40_p0 = scmp.ne.s32.totalorder %s953_s20, %s949_s19  ;;  %p31_p1 = scmp.eq.s32.totalorder %s30_s26, 0 }
   0xf   : > { %p41_p2 = scmp.eq.s32.totalorder %s957_s21, 0  ;;  %p46_p3 = scmp.ne.s32.totalorder %s949_s19, %s945_s18 }
  0x10   : > { %p138_p4 = scmp.eq.s32.totalorder %s1014_s22, 2  ;;  %p144_p7 = scmp.eq.s32.totalorder %s624_s23, 2 }
  0x11   : > { %s1030_s27 = scalar_select %p31_p1, %s953_s20, %s33_s25  }
  0x12   : > { %p1032_p5 = por %p41_p2, %p40_p0  ;;  %p1036_p6 = por %p138_p4, %p40_p0 }
  0x13   : > { %1209 = sst [smem:[#allocation17_spill]] %s1030_s27  ;;  %p717_p8 = scmp.lt.s32.totalorder %s957_s21, 3 }
  0x14   : > { %p1044_p9 = por %p144_p7, %p46_p3  ;;  %s207_s6 = sand.u32 1, %s957_s21  }
  0x15   : > { %s209_s7 = sand.u32 1, %s953_s20   ;;  %s629_s9 = sshll.u32 %s957_s21, 2 }
  0x16   : > { %s628_s8 = sshll.u32 %s209_s7, 2  ;;  %s1213_s0 = sld [smem:[#allocation18_spill]] }
  0x17   : > { %s211_s14 = scalar_lea.vmem [#allocation2], %s628_s8  ;;  %p1056_p10 = pnand %p717_p8, %p1032_p5 }
  0x18   : > { %s219_s15 = sshll.u32 %s211_s14, 4  ;;  %s1060_s17 = sshll.u32 %s209_s7, 3  ;;  %s220_s15 = int_to_ptr.vmem [resolvable:$true] %s219_s15 }
  0x19   : > { %p47_p11 = scmp.eq.s32.totalorder %s1014_s22, 0  ;;  %p177_p13 = scmp.lt.s32.totalorder %s957_s21, 4 }
  0x1a   : > { %s1065_s23 = scalar_lea.sflag [#allocation3], %s207_s6  ;;  %p765_p1 = pneg %p1056_p10 }
  0x1c   : > { %s215_s12 = scalar_lea.hbm %s1213_s0, %s629_s9  ;;  %s768_s7 = scalar_lea.hbm %s1213_s0, 12 }
  0x1d   : > { %s217_s13 = sshll.u32 %s215_s12, 4  ;;  %s218_s13 = int_to_ptr.hbm [resolvable:$true] %s217_s13 }
  0x1e   : > { %s761_s25 = sshra.s32 %s218_s13, 4  ;;  %s762_s25 = int_to_ptr.hbm [resolvable:$true] %s761_s25 }
  0x1f   : > { %s763_s26 = scalar_lea.hbm %s762_s25, 4  ;;  %p769_p5 = scmp.lt.s32.totalorder %s762_s25, %s1213_s0 }
  0x20   : > { %p764_p0 = scmp.ne.s32.totalorder %s762_s25, %s763_s26  ;;  %p770_p7 = scmp.lt.s32.totalorder %s768_s7, %s763_s26 }
  0x22   : > { %p766_p2 = pnand %p765_p1, %p764_p0  ;;  %p771_p8 = por %p770_p7, %p769_p5 }
  0x24   : > { %p767_p4 = pneg %p766_p2 }
  0x26   : > { %p772_p12 = pnand %p771_p8, %p767_p4 }
  0x28   : > { %775 = shalt.err (!%p772_p12)
}
  0x29   : > { %705 = dma.hbm_to_vmem [thread:$0]  (!%p1056_p10), %s218_s13, 64, %s220_s15, %s1065_s23  }
  0x2a   : > { %p1086_p0 = por %p47_p11, %p46_p3  ;;  %p1216_p12 = scmp.ge.s32.totalorder %s957_s21, 1 }
  0x2b   : > { %s1218_s1 = sld [smem:[#allocation19_spill]]  ;;  %s959_s13 = smov [#allocation5]  }
  0x2c   : > { %p1094_p2 = pnand %p1216_p12, %p177_p13  ;;  %s190_s15 = sshll.u32 %s959_s13, 4  ;;  %s191_s15 = int_to_ptr.vmem [resolvable:$true] %s190_s15 }
  0x2d   : > { %s631_s26 = sshll.u32 %s957_s21, 3  ;;  %s960_s28 = smov 64  }
  0x2e   : > { %p698_p4 = pneg %p1094_p2  ;;  %s961_s8 = smov 4  }
  0x2f   : > { %s234_s10 = scalar_lea.hbm %s1202_s3, %s631_s26  ;;  %s230_s12 = scalar_lea.vmem [#allocation7], %s1060_s17 }
  0x30   : > { %p699_p3 = pnand %p698_p4, %p47_p11  ;;  %s238_s14 = sshll.u32 %s230_s12, 4  ;;  %s239_s14 = int_to_ptr.vmem [resolvable:$true] %s238_s14 }
  0x31   : > { %s188_s25 = sshll.u32 %s1218_s1, 4  ;;  %s236_s0 = sshll.u32 %s234_s10, 4  ;;  %s189_s25 = int_to_ptr.hbm [resolvable:$true] %s188_s25  ;;  %s237_s0 = int_to_ptr.hbm [resolvable:$true] %s236_s0 }
  0x32   : > { %701 = dma.hbm_to_vmem [thread:$0]  (!%p699_p3), %s189_s25, 1024, %s191_s15, [#allocation6], %s960_s28, %s960_s28, %s961_s8  }
  0x33   : > { %s821_s1 = sshra.s32 %s237_s0, 4  ;;  %s828_s25 = scalar_lea.hbm %s1202_s3, 24  ;;  %s822_s1 = int_to_ptr.hbm [resolvable:$true] %s821_s1 }
  0x34   : > { %s823_s13 = scalar_lea.hbm %s822_s1, 8  ;;  %p829_p8 = scmp.lt.s32.totalorder %s822_s1, %s1202_s3 }
  0x35   : > { %p824_p13 = scmp.ne.s32.totalorder %s822_s1, %s823_s13  ;;  %p830_p12 = scmp.lt.s32.totalorder %s828_s25, %s823_s13 }
  0x37   : > { %p826_p5 = pnand %p824_p13, %p765_p1  ;;  %p831_p4 = por %p830_p12, %p829_p8 }
  0x39   : > { %p827_p7 = pneg %p826_p5 }
  0x3b   : > { %p832_p3 = pnand %p831_p4, %p827_p7 }
  0x3d   : > { %835 = shalt.err (!%p832_p3)
}
  0x3e   : > { %708 = dma.hbm_to_vmem [thread:$0]  (!%p1056_p10), %s237_s0, 128, %s239_s14, %s1065_s23  }
  0x3f   : > { %247 = sbr.rel (%p1094_p2) target bundleno = 281 (0x119), region = 36  ;;  %s249_s20 = sand.u32 (!%p1094_p2), 1, %s1014_s22  }
  0x40   : > { %s1126_s27 = sand.u32 (!%p1094_p2), 1, %s949_s19   ;;  %s250_s17 = scalar_lea.sflag (!%p1094_p2), [#allocation3], %s249_s20 }
  0x41   : > { %s633_s1 = sshll.u32 (!%p1094_p2), %s1126_s27, 2 }
  0x42   : > { %s253_s26 = scalar_lea.vmem (!%p1094_p2), [#allocation2], %s633_s1 }
  0x44   : > { %924 = dma.done.wait (%p1086_p0), %s250_s17, 64  }
  0x45   : > { %926 = vsyncadd (%p1086_p0), %s250_s17, 4294967232 }
  0x46   : > { %928 = dma.done.wait (%p47_p11), [#allocation6], 1024  }
  0x47   : > { %930 = vsyncadd (%p47_p11), [#allocation6], 4294966272  ;;  %s635_s0 = sshll.u32 %s1126_s27, 3 }
  0x48   : > { %s1140_s16 = scalar_lea.vmem [#allocation7], %s635_s0 }
  0x49   : > { %932 = dma.done.wait (%p1086_p0), %s250_s17, 128  }
  0x4a   : > { %934 = vsyncadd (%p1086_p0), %s250_s17, 4294967168  ;;  %v685_v0 = vld [vmem:[#allocation5 + $0x38] sm:$0xff]  ;;  %v684_v1 = vld [vmem:[#allocation5 + $0x30] sm:$0xff]  ;;  %v390_v9 = vlaneseq  ;;  %s670_s23 = sshll.u32 %s1014_s22, 3  ;;  %s298_s10 = scalar_lea.vmem [#allocation8], %s635_s0 }
  0x4b   : > { %376 = vmatpush.bf16.msra.mxu0 %v685_v0  ;;  %v683_v2 = vld [vmem:[#allocation5 + $0x28] sm:$0xff]  ;;  %v682_v3 = vld [vmem:[#allocation5 + $0x20] sm:$0xff]  ;;  %v681_v4 = vld [vmem:[#allocation5 + $0x18] sm:$0xff]  ;;  %s472_s8 = scalar_lea.hbm %s1203_s4, %s670_s23  ;;  %v393_v12 = vstv %s670_s23  ;;  %s474_s12 = sshll.u32 %s298_s10, 4  ;;  %s475_s12 = int_to_ptr.vmem [resolvable:$true] %s474_s12 }
  0x4c   : > { %v680_v5 = vld [vmem:[#allocation5 + $0x10] sm:$0xff]  ;;  %v679_v6 = vld [vmem:[#allocation5 + $0x8] sm:$0xff]  ;;  %v678_v7 = vld [vmem:[#allocation5] sm:$0xff]  ;;  %v391_v11 = vshrl.u32 %v390_v9, 7  ;;  %s476_s14 = sshll.u32 %s472_s8, 4  ;;  %v396_v16 = vand.u32 127, %v390_v9  ;;  %s477_s14 = int_to_ptr.hbm [resolvable:$true] %s476_s14 }
  0x4d   : > { %v306_v8 = vld [vmem:[%s253_s26] sm:$0xf]  ;;  %s457_s13 = scalar_lea.sflag [#allocation4], %s1126_s27  ;;  %s865_s25 = sshra.s32 %s477_s14, 4  ;;  %s866_s25 = int_to_ptr.hbm [resolvable:$true] %s865_s25 }
  0x4e   : > { %v756_v10 = vld [vmem:[%s1201_s2] ss:$0 sm:$0xff]  ;;  %v394_v15 = vadd.s32 %v393_v12, %v391_v11  ;;  %s867_s15 = scalar_lea.hbm %s866_s25, 8  ;;  %s871_s17 = scalar_lea.hbm %s1203_s4, 24 }
  0x4f   : > { %377 = vmatpush.bf16.msra.mxu0 %v684_v1  ;;  %p868_p10 = scmp.ne.s32.totalorder %s866_s25, %s867_s15  ;;  %p872_p0 = scmp.lt.s32.totalorder %s866_s25, %s1203_s4 }
  0x50   : > { %p873_p2 = scmp.lt.s32.totalorder %s871_s17, %s867_s15 }
  0x51   : > { %p869_p11 = pnand %p868_p10, %p1036_p6 }
  0x52   : > { %p874_p13 = por %p873_p2, %p872_p0 }
  0x53   : > { %378 = vmatpush.bf16.msra.mxu0 %v683_v2  ;;  %p870_p1 = pneg %p869_p11 }
  0x55   : > { %p875_p5 = pnand %p874_p13, %p870_p1 }
  0x57   : > { %379 = vmatpush.bf16.msra.mxu0 %v682_v3 }
  0x5b   : > { %380 = vmatpush.bf16.msra.mxu0 %v681_v4 }
  0x5f   : > { %381 = vmatpush.bf16.msra.mxu0 %v680_v5 }
  0x63   : > { %382 = vmatpush.bf16.msra.mxu0 %v679_v6 }
  0x67   : > { %383 = vmatpush.bf16.msra.mxu0 %v678_v7 }
  0x6a   : > { %384 = vmatmul.bf16.vlgmr.msra.gmra.mxu0 %v306_v8 }
  0xe7   : > { %v385_v13 = vpop.f32.mrf.mxu0 }
  0xe8   : > { %v386_v14 = vadd.f32 %v756_v10, %v385_v13 }
  0xea   : > { %v405_v17 = vand.u32 2147483647, %v386_v14  ;;  %389 = vst [vmem:[%s298_s10] sm:$0xff] %v386_v14 }
  0xeb   : > { %878 = shalt.err (!%p875_p5)
}
  0xec   : > { %694 = dma.vmem_to_hbm [thread:$0]  (%p1036_p6), %s475_s12, 128, %s477_s14, %s457_s13   ;;  %v406_v18 = vsub.f32 0.0, %v405_v17  ;;  %vm397_vm0 = vcmp.lt.s32.totalorder %v394_v15, 24  ;;  %vm398_vm1 = vcmp.lt.s32.totalorder %v396_v16, 10  ;;  %vm420_vm2 = vcmp.gt.f32.partialorder %v386_v14, 0.0  ;;  %v324_v24 = vld [vmem:[%s1140_s16] sm:$0xff] }
  0xed   : > { %vm399_vm3 = vmand %vm397_vm0, %vm398_vm1  ;;  %v962_v21 = vmov 0.0   ;;  %v402_v33 = vmax.f32 %v386_v14, 0.0  ;;  %v403_v34 = vmul.f32 %v386_v14, %v324_v24  ;;  %s675_s16 = sshll.u32 %s1014_s22, 2  ;;  %vm449_vm5 = vcmask 1040384   ;;  %s305_s8 = scalar_lea.vmem [#allocation9], %s633_s1 }
  0xee   : > { %v407_v19 = vmul.f32 1.442695, %v406_v18  ;;  %v671_v22 = vsel %vm399_vm3, 1.0, %v962_v21  ;;  %v421_v23 = vsel %vm420_vm2, 1.0, %v962_v21  ;;  %s486_s11 = scalar_lea.hbm %s1204_s5, %s675_s16  ;;  %vm451_vm6 = vcmask 1041408   ;;  %s488_s7 = sshll.u32 %s305_s8, 4  ;;  %s489_s7 = int_to_ptr.vmem [resolvable:$true] %s488_s7 }
  0xef   : > { %v387_v20 = vpop.f32.mrf.mxu0  ;;  %v422_v25 = vmul.f32 %v671_v22, %v421_v23  ;;  %v423_v26 = vmul.f32 %v671_v22, %v324_v24  ;;  %v404_v41 = vsub.f32 %v402_v33, %v403_v34  ;;  %s490_s22 = sshll.u32 %s486_s11, 4  ;;  %vm453_vm7 = vcmask 1042432   ;;  %s462_s9 = scalar_lea.sflag [#allocation10], %s1126_s27  ;;  %s491_s22 = int_to_ptr.hbm [resolvable:$true] %s490_s22 }
  0xf0   : > { %757 = vpow2.f32 %v407_v19  ;;  %s893_s10 = sshra.s32 %s491_s22, 4  ;;  %s899_s13 = scalar_lea.hbm %s1204_s5, 12  ;;  %s894_s10 = int_to_ptr.hbm [resolvable:$true] %s893_s10 }
  0xf1   : > { %v430_v30 = vmul.f32 %v423_v26, %v422_v25  ;;  %v443_v32 = vrot.slane %v423_v26, 4  ;;  %v437_v37 = vrot.slane %v422_v25, 4  ;;  %s895_s12 = scalar_lea.hbm %s894_s10, 4  ;;  %p900_p4 = scmp.lt.s32.totalorder %s894_s10, %s1204_s5 }
  0xf2   : > { %p896_p7 = scmp.ne.s32.totalorder %s894_s10, %s895_s12  ;;  %p901_p3 = scmp.lt.s32.totalorder %s899_s13, %s895_s12 }
  0xf3   : > { %v431_v36 = vrot.slane %v430_v30, 4  ;;  %v444_v43 = vadd.f32 %v443_v32, %v423_v26  ;;  %v438_v45 = vadd.f32 %v437_v37, %v422_v25 }
  0xf4   : > { %p897_p8 = pnand %p896_p7, %p1036_p6  ;;  %p902_p10 = por %p901_p3, %p900_p4 }
  0xf5   : > { %v432_v42 = vadd.f32 %v431_v36, %v430_v30  ;;  %v445_v49 = vrot.slane %v444_v43, 2  ;;  %v439_v50 = vrot.slane %v438_v45, 2 }
  0xf6   : > { %v758_v27 = vpop.eup %757  ;;  %p898_p12 = pneg %p897_p8 }
  0xf7   : > { %v409_v28 = vadd.f32 1.0, %v758_v27  ;;  %v412_v29 = vmul.f32 -0.5, %v758_v27  ;;  %v415_v35 = vand.u32 2147483647, %v758_v27  ;;  %v433_v48 = vrot.slane %v432_v42, 2 }
  0xf8   : > { %v446_v54 = vadd.f32 %v445_v49, %v444_v43  ;;  %v440_v55 = vadd.f32 %v439_v50, %v438_v45  ;;  %p903_p11 = pnand %p902_p10, %p898_p12 }
  0xf9   : > { %759 = vlog2.f32 %v409_v28  ;;  %v413_v31 = vadd.f32 1.0, %v412_v29  ;;  %vm416_vm4 = vcmp.lt.f32.partialorder %v415_v35, 0.0004427343  ;;  %v434_v53 = vadd.f32 %v433_v48, %v432_v42 }
  0xfa   : > { %v447_v59 = vrot.slane %v446_v54, 1  ;;  %v441_v60 = vrot.slane %v440_v55, 1 }
  0xfb   : > { %v414_v40 = vmul.f32 %v758_v27, %v413_v31  ;;  %v435_v58 = vrot.slane %v434_v53, 1 }
  0xfc   : > { %v448_v0 = vadd.f32 %v447_v59, %v446_v54  ;;  %v442_v1 = vadd.f32 %v441_v60, %v440_v55 }
  0xfd   : > { %v436_v63 = vadd.f32 %v435_v58, %v434_v53 }
  0xff   : > { %v760_v38 = vpop.eup %759 }
 0x100   : > { %v411_v39 = vmul.f32 0.6931472, %v760_v38 }
 0x102   : > { %v417_v44 = vsel %vm416_vm4, %v414_v40, %v411_v39 }
 0x103   : > { %v418_v46 = vadd.f32 %v417_v44, %v404_v41 }
 0x105   : > { %v419_v47 = vmul.f32 %v671_v22, %v418_v46 }
 0x107   : > { %v424_v51 = vrot.slane %v419_v47, 4 }
 0x109   : > { %v425_v52 = vadd.f32 %v424_v51, %v419_v47 }
 0x10b   : > { %v426_v56 = vrot.slane %v425_v52, 2 }
 0x10d   : > { %v427_v57 = vadd.f32 %v426_v56, %v425_v52 }
 0x10f   : > { %v428_v61 = vrot.slane %v427_v57, 1 }
 0x111   : > { %v429_v62 = vadd.f32 %v428_v61, %v427_v57 }
 0x113   : > { %v450_v2 = vsel %vm449_vm5, %v429_v62, %v436_v63 }
 0x114   : > { %v452_v3 = vsel %vm451_vm6, %v450_v2, %v442_v1 }
 0x115   : > { %v454_v4 = vsel %vm453_vm7, %v452_v3, %v448_v0 }
 0x116   : > { %455 = vst [vmem:[%s305_s8] sm:$0xf] %v454_v4 }
 0x117   : > { %906 = shalt.err (!%p903_p11)
}
 0x118   : > { %695 = dma.vmem_to_hbm [thread:$0]  (%p1036_p6), %s489_s7, 64, %s491_s22, %s462_s9  }
 0x119 PF: > { %p719_p1 = scmp.ge.s32.totalorder %s957_s21, 2  ;;  %s502_s27 = sand.u32 1, %s945_s18  }
 0x11a   : > { %s503_s28 = scalar_lea.sflag [#allocation4], %s502_s27 }
 0x11b   : > { %p710_p0 = pnand %p719_p1, %p1044_p9 }
 0x11d   : > { %p711_p2 = pneg %p710_p0 }
 0x11f   : > { %936 = dma.done.wait (%p711_p2), %s503_s28, 128  }
 0x120   : > { %938 = vsyncadd (%p711_p2), %s503_s28, 4294967168  ;;  %s513_s20 = scalar_lea.sflag [#allocation10], %s502_s27 }
 0x121   : > { %940 = dma.done.wait (%p711_p2), %s513_s20, 64  }
 0x122   : > { %942 = vsyncadd (%p711_p2), %s513_s20, 4294967232  ;;  %s1219_s17 = sld [smem:[#allocation16_spill]]  ;;  %p23_p6 = scmp.ge.s32.totalorder %s1018_s24, 5  }
 0x123   : > { %s1220_s20 = sld [smem:[#allocation17_spill]]  ;;  %s1221_s18 = smov %s949_s19 }
 0x124   : > { %s1223_s21 = smov %s1018_s24  ;;  %25 = sbr.rel (!%p23_p6) target bundleno = 11 (0xb), region = 113 }
 0x128   : > { %s1222_s19 = smov %s1219_s17 }
 0x129   :  { %519 = vsyncpa [#allocation3], 1 }
 0x12a   :  { %521 = vsyncpa [#allocation3 + $0x1], 1 }
 0x12b   :  { %522 = vsyncpa [#allocation6], 1 }
 0x12c   :  { %523 = vsyncpa [#allocation4], 1 }
 0x12d   :  { %525 = vsyncpa [#allocation4 + $0x1], 1 }
 0x12e   :  { %526 = vsyncpa [#allocation10], 1 }
 0x12f   :  { %528 = vsyncpa [#allocation10 + $0x1], 1 }

</bundles_post_ra>
